<compile_context>
chip_gen: v7x
topology: tpu7x:2x2x1
jax: 0.10.0
libtpu: 0.0.40
codegen_flags: <defaults>
</compile_context>

<pallas_src>
import jax
import jax.numpy as jnp
from jax.experimental import pallas as pl
from jax.experimental.pallas import tpu as pltpu

LANES = 128
SUBLANES = 8


def _round_up(x, m):
    return ((x + m - 1) // m) * m


def encoder_kernel(idx_ref,      # SMEM (Bp,) int32        -- scalar prefetch
                   table_ref,    # HBM  (num_nodes, 3*Dp)  -- pl.ANY, f32
                   w1t_ref,      # VMEM (3*Dp, Dp) bf16
                   b1_ref,       # VMEM (1, Dp)    f32
                   w2t_ref,      # VMEM (Dp, 3)    bf16
                   b2_ref,       # VMEM (1, 3)     f32
                   out_ref,      # VMEM (TB, Dp)   f32
                   comb_ref,     # VMEM scratch (TB, 3*Dp) f32
                   sem):         # DMA semaphores (TB,)
    TB, three_dp = comb_ref.shape
    Dp = three_dp // 3
    base = pl.program_id(0) * TB

    # ---- fused embedding gather: one row DMA per batch element in the tile ----
    copies = []
    for r in range(TB):                       # TB is small & static -> unrolled
        row = idx_ref[base + r]
        cp = pltpu.make_async_copy(table_ref.at[pl.ds(row, 1)],
                                   comb_ref.at[pl.ds(r, 1)],
                                   sem.at[r])
        cp.start()
        copies.append(cp)
    for cp in copies:
        cp.wait()

    comb = comb_ref[...]                      # (TB, 3*Dp) f32  [nf | ng | em]
    comb_bf = comb.astype(jnp.bfloat16)

    # att1: Linear(3D -> D) as ONE MXU dot (K = 3*Dp), f32 accumulation.
    h = jnp.dot(comb_bf, w1t_ref[...],
                preferred_element_type=jnp.float32) + b1_ref[...]
    h = jnp.maximum(h, 0.0)                   # F.relu(..., inplace=True)
    # TODO(synk): F.dropout is identity (eval mode); torch RNG not reproduced.

    # att2: Linear(D -> 3), then a 3-way softmax kept element-wise on (TB, 1)
    # slices (no cross-lane reduction); divide on the EUP via approx reciprocal.
    logits = jnp.dot(h.astype(jnp.bfloat16), w2t_ref[...],
                     preferred_element_type=jnp.float32) + b2_ref[...]
    l0 = logits[:, 0:1]
    l1 = logits[:, 1:2]
    l2 = logits[:, 2:3]
    m = jnp.maximum(jnp.maximum(l0, l1), l2)
    e0 = jnp.exp(l0 - m)
    e1 = jnp.exp(l1 - m)
    e2 = jnp.exp(l2 - m)
    inv = pl.reciprocal(e0 + e1 + e2, approx=True)

    nf = comb[:, 0:Dp]
    ng = comb[:, Dp:2 * Dp]
    em = comb[:, 2 * Dp:3 * Dp]
    # weighted combination (the `.repeat` calls in the reference are no-ops)
    out_ref[...] = nf * (e0 * inv) + ng * (e1 * inv) + em * (e2 * inv)


def prepare_encoder(feat_table, neigh_table, agg_table, w1, b1, w2, b2):
    """One-time prep: stack/pad tables, pre-transpose + pad + bf16-cast weights."""
    num_nodes, D = feat_table.shape
    Dp = _round_up(D, LANES)

    def pad_feat(t):
        return jnp.pad(t, ((0, 0), (0, Dp - D)))

    # Contiguous per-node [nodes_fea | neighs_feature | embed_matrix] rows.
    stacked_table = jnp.concatenate(
        [pad_feat(feat_table), pad_feat(neigh_table), pad_feat(agg_table)],
        axis=1).astype(jnp.float32)                       # (num_nodes, 3*Dp)

    # att1: torch weight (D, 3D) -> transposed/padded (3*Dp, Dp), bf16.
    w1t = jnp.concatenate(
        [jnp.pad(blk.T, ((0, Dp - D), (0, Dp - D)))
         for blk in jnp.split(w1, 3, axis=1)], axis=0).astype(jnp.bfloat16)
    b1p = jnp.pad(b1, (0, Dp - D)).reshape(1, Dp).astype(jnp.float32)

    # att2: torch weight (3, D) -> transposed/padded (Dp, 3), bf16.
    w2t = jnp.pad(w2.T, ((0, Dp - D), (0, 0))).astype(jnp.bfloat16)
    b2p = b2.reshape(1, 3).astype(jnp.float32)

    return dict(stacked_table=stacked_table, w1t=w1t, b1=b1p, w2t=w2t, b2=b2p,
                D=D, Dp=Dp)


def encoder_forward(nodes_u, params, *, tb=None):
    stacked_table = params["stacked_table"]
    w1t, b1, w2t, b2 = params["w1t"], params["b1"], params["w2t"], params["b2"]
    D, Dp = params["D"], params["Dp"]
    three_dp = 3 * Dp

    B = nodes_u.shape[0]
    if tb is None:
        # Batch tile: sublane-aligned, modest unroll, comfortably within the
        # 32 MiB scoped-VMEM budget we request below (v7x-safe).
        tb = min(_round_up(B, SUBLANES), 64)
    Bp = _round_up(B, tb)
    nb = Bp // tb

    idx = jnp.zeros((Bp,), jnp.int32).at[:B].set(nodes_u.astype(jnp.int32))

    grid_spec = pltpu.PrefetchScalarGridSpec(
        num_scalar_prefetch=1,
        grid=(nb,),
        in_specs=[
            pl.BlockSpec(memory_space=pl.ANY),                    # stacked table (HBM)
            pl.BlockSpec((three_dp, Dp), lambda i, _: (0, 0)),    # w1t (VMEM resident)
            pl.BlockSpec((1, Dp), lambda i, _: (0, 0)),           # b1
            pl.BlockSpec((Dp, 3), lambda i, _: (0, 0)),           # w2t
            pl.BlockSpec((1, 3), lambda i, _: (0, 0)),            # b2
        ],
        out_specs=pl.BlockSpec((tb, Dp), lambda i, _: (i, 0)),
        scratch_shapes=[
            pltpu.VMEM((tb, three_dp), jnp.float32),              # gathered rows
            pltpu.SemaphoreType.DMA((tb,)),
        ],
    )

    out = pl.pallas_call(
        encoder_kernel,
        grid_spec=grid_spec,
        out_shape=jax.ShapeDtypeStruct((Bp, Dp), jnp.float32),
        compiler_params=pltpu.CompilerParams(
            dimension_semantics=("parallel",),
            vmem_limit_bytes=32 * 1024 * 1024,
        ),
    )(idx, stacked_table, w1t, b1, w2t, b2)

    return out[:B, :D]


if __name__ == "__main__":
    B, D, num_nodes = 8, 32, 64
    key = jax.random.PRNGKey(0)
    ks = jax.random.split(key, 8)

    # External modules (aggregator / neighs_feature) modeled as lookup tables.
    feat_table = jax.random.normal(ks[0], (num_nodes, D), jnp.float32)
    neigh_table = jax.random.normal(ks[1], (num_nodes, D), jnp.float32)
    agg_table = jax.random.normal(ks[2], (num_nodes, D), jnp.float32)
    nodes_u = jax.random.randint(ks[3], (B,), 0, num_nodes)

    # att1: Linear(3D, D); att2: Linear(D, 3)  (torch weight layouts).
    w1 = jax.random.normal(ks[4], (D, 3 * D), jnp.float32) * 0.1
    b1 = jax.random.normal(ks[5], (D,), jnp.float32) * 0.1
    w2 = jax.random.normal(ks[6], (3, D), jnp.float32) * 0.1
    b2 = jax.random.normal(ks[7], (3,), jnp.float32) * 0.1

    params = prepare_encoder(feat_table, neigh_table, agg_table, w1, b1, w2, b2)
    out = encoder_forward(nodes_u, params)
    jax.block_until_ready(out)

    # Plain-JAX reference with the same bf16 weight/activation rounding the
    # kernel's MXU path uses (accumulation stays f32).
    nodes_fea = feat_table[nodes_u]
    neighs = neigh_table[nodes_u]
    embed_m = agg_table[nodes_u]
    combined = jnp.concatenate([nodes_fea, neighs, embed_m], axis=1)

    def bf(x):
        return x.astype(jnp.bfloat16).astype(jnp.float32)

    h_ref = jax.nn.relu(bf(combined) @ bf(w1.T) + b1)
    att_ref = jax.nn.softmax(bf(h_ref) @ bf(w2.T) + b2, axis=1)
    ref = (nodes_fea * att_ref[:, 0:1]
           + neighs * att_ref[:, 1:2]
           + embed_m * att_ref[:, 2:3])

    assert out.shape == (B, D)
    err = float(jnp.max(jnp.abs(out - ref)))
    assert err < 1e-2, f"mismatch vs reference: max abs err {err}"

    print("KERNEL_OK")
</pallas_src>

<mosaic_0001>
module attributes {stable_mosaic.version = 11 : i64} {
  func.func @encoder_kernel(%arg0: i32, %arg1: memref<8xi32, #tpu.memory_space<smem>>, %arg2: memref<64x384xf32, #tpu.memory_space<any>>, %arg3: memref<384x128xbf16, #tpu.memory_space<vmem>>, %arg4: memref<1x128xf32, #tpu.memory_space<vmem>>, %arg5: memref<128x3xbf16, #tpu.memory_space<vmem>>, %arg6: memref<1x3xf32, #tpu.memory_space<vmem>>, %arg7: memref<8x128xf32, #tpu.memory_space<vmem>>, %arg8: memref<8x384xf32, #tpu.memory_space<vmem>>, %arg9: memref<8x!tpu.dma_semaphore, #tpu.memory_space<semaphore_mem>>) attributes {dimension_semantics = [#tpu.dimension_semantics<parallel>], iteration_bounds = array<i64: 1>, scalar_prefetch = 1 : i64, scratch_operands = 2 : i64, tpu.core_type = #tpu.core_type<tc>, window_params = [{}, {pipeline_mode = #tpu.pipeline_mode<synchronous>, transform_indices = @transform_1, window_bounds = array<i64: 384, 128>}, {pipeline_mode = #tpu.pipeline_mode<synchronous>, transform_indices = @transform_2, window_bounds = array<i64: 1, 128>}, {pipeline_mode = #tpu.pipeline_mode<synchronous>, transform_indices = @transform_3, window_bounds = array<i64: 128, 3>}, {pipeline_mode = #tpu.pipeline_mode<synchronous>, transform_indices = @transform_4, window_bounds = array<i64: 1, 3>}, {transform_indices = @transform_5, window_bounds = array<i64: 8, 128>}]} {
    %c8_i32 = arith.constant 8 : i32
    %0 = arith.muli %arg0, %c8_i32 : i32
    %c0_i32 = arith.constant 0 : i32
    %1 = arith.addi %0, %c0_i32 : i32
    %2 = arith.index_cast %1 : i32 to index
    %3 = memref.load %arg1[%2] : memref<8xi32, #tpu.memory_space<smem>>
    %c0_i32_0 = arith.constant 0 : i32
    %c0_i32_1 = arith.constant 0 : i32
    %4 = tpu.memref_slice %arg2[%3, %c0_i32_1] : memref<64x384xf32, #tpu.memory_space<any>> -> memref<1x384xf32, #tpu.memory_space<any>>
    %c0_i32_2 = arith.constant 0 : i32
    %c0_i32_3 = arith.constant 0 : i32
    %5 = tpu.memref_slice %arg8[%c0_i32_2, %c0_i32_3] : memref<8x384xf32, #tpu.memory_space<vmem>> -> memref<1x384xf32, #tpu.memory_space<vmem>>
    %6 = tpu.memref_slice %arg9[%c0_i32_0] : memref<8x!tpu.dma_semaphore, #tpu.memory_space<semaphore_mem>> -> memref<1x!tpu.dma_semaphore, #tpu.memory_space<semaphore_mem>>
    %7 = tpu.memref_squeeze %6 : memref<1x!tpu.dma_semaphore, #tpu.memory_space<semaphore_mem>> -> memref<!tpu.dma_semaphore, #tpu.memory_space<semaphore_mem>>
    tpu.enqueue_dma source(%4 : memref<1x384xf32, #tpu.memory_space<any>>) target(%5 : memref<1x384xf32, #tpu.memory_space<vmem>>) target_semaphore(%7 : memref<!tpu.dma_semaphore, #tpu.memory_space<semaphore_mem>>)
    %c1_i32 = arith.constant 1 : i32
    %8 = arith.addi %0, %c1_i32 : i32
    %9 = arith.index_cast %8 : i32 to index
    %10 = memref.load %arg1[%9] : memref<8xi32, #tpu.memory_space<smem>>
    %c1_i32_4 = arith.constant 1 : i32
    %c0_i32_5 = arith.constant 0 : i32
    %11 = tpu.memref_slice %arg2[%10, %c0_i32_5] : memref<64x384xf32, #tpu.memory_space<any>> -> memref<1x384xf32, #tpu.memory_space<any>>
    %c1_i32_6 = arith.constant 1 : i32
    %c0_i32_7 = arith.constant 0 : i32
    %12 = tpu.memref_slice %arg8[%c1_i32_6, %c0_i32_7] : memref<8x384xf32, #tpu.memory_space<vmem>> -> memref<1x384xf32, #tpu.memory_space<vmem>>
    %13 = tpu.memref_slice %arg9[%c1_i32_4] : memref<8x!tpu.dma_semaphore, #tpu.memory_space<semaphore_mem>> -> memref<1x!tpu.dma_semaphore, #tpu.memory_space<semaphore_mem>>
    %14 = tpu.memref_squeeze %13 : memref<1x!tpu.dma_semaphore, #tpu.memory_space<semaphore_mem>> -> memref<!tpu.dma_semaphore, #tpu.memory_space<semaphore_mem>>
    tpu.enqueue_dma source(%11 : memref<1x384xf32, #tpu.memory_space<any>>) target(%12 : memref<1x384xf32, #tpu.memory_space<vmem>>) target_semaphore(%14 : memref<!tpu.dma_semaphore, #tpu.memory_space<semaphore_mem>>)
    %c2_i32 = arith.constant 2 : i32
    %15 = arith.addi %0, %c2_i32 : i32
    %16 = arith.index_cast %15 : i32 to index
    %17 = memref.load %arg1[%16] : memref<8xi32, #tpu.memory_space<smem>>
    %c2_i32_8 = arith.constant 2 : i32
    %c0_i32_9 = arith.constant 0 : i32
    %18 = tpu.memref_slice %arg2[%17, %c0_i32_9] : memref<64x384xf32, #tpu.memory_space<any>> -> memref<1x384xf32, #tpu.memory_space<any>>
    %c2_i32_10 = arith.constant 2 : i32
    %c0_i32_11 = arith.constant 0 : i32
    %19 = tpu.memref_slice %arg8[%c2_i32_10, %c0_i32_11] : memref<8x384xf32, #tpu.memory_space<vmem>> -> memref<1x384xf32, #tpu.memory_space<vmem>>
    %20 = tpu.memref_slice %arg9[%c2_i32_8] : memref<8x!tpu.dma_semaphore, #tpu.memory_space<semaphore_mem>> -> memref<1x!tpu.dma_semaphore, #tpu.memory_space<semaphore_mem>>
    %21 = tpu.memref_squeeze %20 : memref<1x!tpu.dma_semaphore, #tpu.memory_space<semaphore_mem>> -> memref<!tpu.dma_semaphore, #tpu.memory_space<semaphore_mem>>
    tpu.enqueue_dma source(%18 : memref<1x384xf32, #tpu.memory_space<any>>) target(%19 : memref<1x384xf32, #tpu.memory_space<vmem>>) target_semaphore(%21 : memref<!tpu.dma_semaphore, #tpu.memory_space<semaphore_mem>>)
    %c3_i32 = arith.constant 3 : i32
    %22 = arith.addi %0, %c3_i32 : i32
    %23 = arith.index_cast %22 : i32 to index
    %24 = memref.load %arg1[%23] : memref<8xi32, #tpu.memory_space<smem>>
    %c3_i32_12 = arith.constant 3 : i32
    %c0_i32_13 = arith.constant 0 : i32
    %25 = tpu.memref_slice %arg2[%24, %c0_i32_13] : memref<64x384xf32, #tpu.memory_space<any>> -> memref<1x384xf32, #tpu.memory_space<any>>
    %c3_i32_14 = arith.constant 3 : i32
    %c0_i32_15 = arith.constant 0 : i32
    %26 = tpu.memref_slice %arg8[%c3_i32_14, %c0_i32_15] : memref<8x384xf32, #tpu.memory_space<vmem>> -> memref<1x384xf32, #tpu.memory_space<vmem>>
    %27 = tpu.memref_slice %arg9[%c3_i32_12] : memref<8x!tpu.dma_semaphore, #tpu.memory_space<semaphore_mem>> -> memref<1x!tpu.dma_semaphore, #tpu.memory_space<semaphore_mem>>
    %28 = tpu.memref_squeeze %27 : memref<1x!tpu.dma_semaphore, #tpu.memory_space<semaphore_mem>> -> memref<!tpu.dma_semaphore, #tpu.memory_space<semaphore_mem>>
    tpu.enqueue_dma source(%25 : memref<1x384xf32, #tpu.memory_space<any>>) target(%26 : memref<1x384xf32, #tpu.memory_space<vmem>>) target_semaphore(%28 : memref<!tpu.dma_semaphore, #tpu.memory_space<semaphore_mem>>)
    %c4_i32 = arith.constant 4 : i32
    %29 = arith.addi %0, %c4_i32 : i32
    %30 = arith.index_cast %29 : i32 to index
    %31 = memref.load %arg1[%30] : memref<8xi32, #tpu.memory_space<smem>>
    %c4_i32_16 = arith.constant 4 : i32
    %c0_i32_17 = arith.constant 0 : i32
    %32 = tpu.memref_slice %arg2[%31, %c0_i32_17] : memref<64x384xf32, #tpu.memory_space<any>> -> memref<1x384xf32, #tpu.memory_space<any>>
    %c4_i32_18 = arith.constant 4 : i32
    %c0_i32_19 = arith.constant 0 : i32
    %33 = tpu.memref_slice %arg8[%c4_i32_18, %c0_i32_19] : memref<8x384xf32, #tpu.memory_space<vmem>> -> memref<1x384xf32, #tpu.memory_space<vmem>>
    %34 = tpu.memref_slice %arg9[%c4_i32_16] : memref<8x!tpu.dma_semaphore, #tpu.memory_space<semaphore_mem>> -> memref<1x!tpu.dma_semaphore, #tpu.memory_space<semaphore_mem>>
    %35 = tpu.memref_squeeze %34 : memref<1x!tpu.dma_semaphore, #tpu.memory_space<semaphore_mem>> -> memref<!tpu.dma_semaphore, #tpu.memory_space<semaphore_mem>>
    tpu.enqueue_dma source(%32 : memref<1x384xf32, #tpu.memory_space<any>>) target(%33 : memref<1x384xf32, #tpu.memory_space<vmem>>) target_semaphore(%35 : memref<!tpu.dma_semaphore, #tpu.memory_space<semaphore_mem>>)
    %c5_i32 = arith.constant 5 : i32
    %36 = arith.addi %0, %c5_i32 : i32
    %37 = arith.index_cast %36 : i32 to index
    %38 = memref.load %arg1[%37] : memref<8xi32, #tpu.memory_space<smem>>
    %c5_i32_20 = arith.constant 5 : i32
    %c0_i32_21 = arith.constant 0 : i32
    %39 = tpu.memref_slice %arg2[%38, %c0_i32_21] : memref<64x384xf32, #tpu.memory_space<any>> -> memref<1x384xf32, #tpu.memory_space<any>>
    %c5_i32_22 = arith.constant 5 : i32
    %c0_i32_23 = arith.constant 0 : i32
    %40 = tpu.memref_slice %arg8[%c5_i32_22, %c0_i32_23] : memref<8x384xf32, #tpu.memory_space<vmem>> -> memref<1x384xf32, #tpu.memory_space<vmem>>
    %41 = tpu.memref_slice %arg9[%c5_i32_20] : memref<8x!tpu.dma_semaphore, #tpu.memory_space<semaphore_mem>> -> memref<1x!tpu.dma_semaphore, #tpu.memory_space<semaphore_mem>>
    %42 = tpu.memref_squeeze %41 : memref<1x!tpu.dma_semaphore, #tpu.memory_space<semaphore_mem>> -> memref<!tpu.dma_semaphore, #tpu.memory_space<semaphore_mem>>
    tpu.enqueue_dma source(%39 : memref<1x384xf32, #tpu.memory_space<any>>) target(%40 : memref<1x384xf32, #tpu.memory_space<vmem>>) target_semaphore(%42 : memref<!tpu.dma_semaphore, #tpu.memory_space<semaphore_mem>>)
    %c6_i32 = arith.constant 6 : i32
    %43 = arith.addi %0, %c6_i32 : i32
    %44 = arith.index_cast %43 : i32 to index
    %45 = memref.load %arg1[%44] : memref<8xi32, #tpu.memory_space<smem>>
    %c6_i32_24 = arith.constant 6 : i32
    %c0_i32_25 = arith.constant 0 : i32
    %46 = tpu.memref_slice %arg2[%45, %c0_i32_25] : memref<64x384xf32, #tpu.memory_space<any>> -> memref<1x384xf32, #tpu.memory_space<any>>
    %c6_i32_26 = arith.constant 6 : i32
    %c0_i32_27 = arith.constant 0 : i32
    %47 = tpu.memref_slice %arg8[%c6_i32_26, %c0_i32_27] : memref<8x384xf32, #tpu.memory_space<vmem>> -> memref<1x384xf32, #tpu.memory_space<vmem>>
    %48 = tpu.memref_slice %arg9[%c6_i32_24] : memref<8x!tpu.dma_semaphore, #tpu.memory_space<semaphore_mem>> -> memref<1x!tpu.dma_semaphore, #tpu.memory_space<semaphore_mem>>
    %49 = tpu.memref_squeeze %48 : memref<1x!tpu.dma_semaphore, #tpu.memory_space<semaphore_mem>> -> memref<!tpu.dma_semaphore, #tpu.memory_space<semaphore_mem>>
    tpu.enqueue_dma source(%46 : memref<1x384xf32, #tpu.memory_space<any>>) target(%47 : memref<1x384xf32, #tpu.memory_space<vmem>>) target_semaphore(%49 : memref<!tpu.dma_semaphore, #tpu.memory_space<semaphore_mem>>)
    %c7_i32 = arith.constant 7 : i32
    %50 = arith.addi %0, %c7_i32 : i32
    %51 = arith.index_cast %50 : i32 to index
    %52 = memref.load %arg1[%51] : memref<8xi32, #tpu.memory_space<smem>>
    %c7_i32_28 = arith.constant 7 : i32
    %c0_i32_29 = arith.constant 0 : i32
    %53 = tpu.memref_slice %arg2[%52, %c0_i32_29] : memref<64x384xf32, #tpu.memory_space<any>> -> memref<1x384xf32, #tpu.memory_space<any>>
    %c7_i32_30 = arith.constant 7 : i32
    %c0_i32_31 = arith.constant 0 : i32
    %54 = tpu.memref_slice %arg8[%c7_i32_30, %c0_i32_31] : memref<8x384xf32, #tpu.memory_space<vmem>> -> memref<1x384xf32, #tpu.memory_space<vmem>>
    %55 = tpu.memref_slice %arg9[%c7_i32_28] : memref<8x!tpu.dma_semaphore, #tpu.memory_space<semaphore_mem>> -> memref<1x!tpu.dma_semaphore, #tpu.memory_space<semaphore_mem>>
    %56 = tpu.memref_squeeze %55 : memref<1x!tpu.dma_semaphore, #tpu.memory_space<semaphore_mem>> -> memref<!tpu.dma_semaphore, #tpu.memory_space<semaphore_mem>>
    tpu.enqueue_dma source(%53 : memref<1x384xf32, #tpu.memory_space<any>>) target(%54 : memref<1x384xf32, #tpu.memory_space<vmem>>) target_semaphore(%56 : memref<!tpu.dma_semaphore, #tpu.memory_space<semaphore_mem>>)
    %c0_i32_32 = arith.constant 0 : i32
    %c0_i32_33 = arith.constant 0 : i32
    %57 = tpu.memref_slice %arg2[%3, %c0_i32_33] : memref<64x384xf32, #tpu.memory_space<any>> -> memref<1x384xf32, #tpu.memory_space<any>>
    %c0_i32_34 = arith.constant 0 : i32
    %c0_i32_35 = arith.constant 0 : i32
    %58 = tpu.memref_slice %arg8[%c0_i32_34, %c0_i32_35] : memref<8x384xf32, #tpu.memory_space<vmem>> -> memref<1x384xf32, #tpu.memory_space<vmem>>
    %59 = tpu.memref_slice %arg9[%c0_i32_32] : memref<8x!tpu.dma_semaphore, #tpu.memory_space<semaphore_mem>> -> memref<1x!tpu.dma_semaphore, #tpu.memory_space<semaphore_mem>>
    %60 = tpu.memref_squeeze %59 : memref<1x!tpu.dma_semaphore, #tpu.memory_space<semaphore_mem>> -> memref<!tpu.dma_semaphore, #tpu.memory_space<semaphore_mem>>
    tpu.wait_dma2 semaphore(%60 : memref<!tpu.dma_semaphore, #tpu.memory_space<semaphore_mem>>) src(%57 : memref<1x384xf32, #tpu.memory_space<any>>) dst(%58 : memref<1x384xf32, #tpu.memory_space<vmem>>)
    %c1_i32_36 = arith.constant 1 : i32
    %c0_i32_37 = arith.constant 0 : i32
    %61 = tpu.memref_slice %arg2[%10, %c0_i32_37] : memref<64x384xf32, #tpu.memory_space<any>> -> memref<1x384xf32, #tpu.memory_space<any>>
    %c1_i32_38 = arith.constant 1 : i32
    %c0_i32_39 = arith.constant 0 : i32
    %62 = tpu.memref_slice %arg8[%c1_i32_38, %c0_i32_39] : memref<8x384xf32, #tpu.memory_space<vmem>> -> memref<1x384xf32, #tpu.memory_space<vmem>>
    %63 = tpu.memref_slice %arg9[%c1_i32_36] : memref<8x!tpu.dma_semaphore, #tpu.memory_space<semaphore_mem>> -> memref<1x!tpu.dma_semaphore, #tpu.memory_space<semaphore_mem>>
    %64 = tpu.memref_squeeze %63 : memref<1x!tpu.dma_semaphore, #tpu.memory_space<semaphore_mem>> -> memref<!tpu.dma_semaphore, #tpu.memory_space<semaphore_mem>>
    tpu.wait_dma2 semaphore(%64 : memref<!tpu.dma_semaphore, #tpu.memory_space<semaphore_mem>>) src(%61 : memref<1x384xf32, #tpu.memory_space<any>>) dst(%62 : memref<1x384xf32, #tpu.memory_space<vmem>>)
    %c2_i32_40 = arith.constant 2 : i32
    %c0_i32_41 = arith.constant 0 : i32
    %65 = tpu.memref_slice %arg2[%17, %c0_i32_41] : memref<64x384xf32, #tpu.memory_space<any>> -> memref<1x384xf32, #tpu.memory_space<any>>
    %c2_i32_42 = arith.constant 2 : i32
    %c0_i32_43 = arith.constant 0 : i32
    %66 = tpu.memref_slice %arg8[%c2_i32_42, %c0_i32_43] : memref<8x384xf32, #tpu.memory_space<vmem>> -> memref<1x384xf32, #tpu.memory_space<vmem>>
    %67 = tpu.memref_slice %arg9[%c2_i32_40] : memref<8x!tpu.dma_semaphore, #tpu.memory_space<semaphore_mem>> -> memref<1x!tpu.dma_semaphore, #tpu.memory_space<semaphore_mem>>
    %68 = tpu.memref_squeeze %67 : memref<1x!tpu.dma_semaphore, #tpu.memory_space<semaphore_mem>> -> memref<!tpu.dma_semaphore, #tpu.memory_space<semaphore_mem>>
    tpu.wait_dma2 semaphore(%68 : memref<!tpu.dma_semaphore, #tpu.memory_space<semaphore_mem>>) src(%65 : memref<1x384xf32, #tpu.memory_space<any>>) dst(%66 : memref<1x384xf32, #tpu.memory_space<vmem>>)
    %c3_i32_44 = arith.constant 3 : i32
    %c0_i32_45 = arith.constant 0 : i32
    %69 = tpu.memref_slice %arg2[%24, %c0_i32_45] : memref<64x384xf32, #tpu.memory_space<any>> -> memref<1x384xf32, #tpu.memory_space<any>>
    %c3_i32_46 = arith.constant 3 : i32
    %c0_i32_47 = arith.constant 0 : i32
    %70 = tpu.memref_slice %arg8[%c3_i32_46, %c0_i32_47] : memref<8x384xf32, #tpu.memory_space<vmem>> -> memref<1x384xf32, #tpu.memory_space<vmem>>
    %71 = tpu.memref_slice %arg9[%c3_i32_44] : memref<8x!tpu.dma_semaphore, #tpu.memory_space<semaphore_mem>> -> memref<1x!tpu.dma_semaphore, #tpu.memory_space<semaphore_mem>>
    %72 = tpu.memref_squeeze %71 : memref<1x!tpu.dma_semaphore, #tpu.memory_space<semaphore_mem>> -> memref<!tpu.dma_semaphore, #tpu.memory_space<semaphore_mem>>
    tpu.wait_dma2 semaphore(%72 : memref<!tpu.dma_semaphore, #tpu.memory_space<semaphore_mem>>) src(%69 : memref<1x384xf32, #tpu.memory_space<any>>) dst(%70 : memref<1x384xf32, #tpu.memory_space<vmem>>)
    %c4_i32_48 = arith.constant 4 : i32
    %c0_i32_49 = arith.constant 0 : i32
    %73 = tpu.memref_slice %arg2[%31, %c0_i32_49] : memref<64x384xf32, #tpu.memory_space<any>> -> memref<1x384xf32, #tpu.memory_space<any>>
    %c4_i32_50 = arith.constant 4 : i32
    %c0_i32_51 = arith.constant 0 : i32
    %74 = tpu.memref_slice %arg8[%c4_i32_50, %c0_i32_51] : memref<8x384xf32, #tpu.memory_space<vmem>> -> memref<1x384xf32, #tpu.memory_space<vmem>>
    %75 = tpu.memref_slice %arg9[%c4_i32_48] : memref<8x!tpu.dma_semaphore, #tpu.memory_space<semaphore_mem>> -> memref<1x!tpu.dma_semaphore, #tpu.memory_space<semaphore_mem>>
    %76 = tpu.memref_squeeze %75 : memref<1x!tpu.dma_semaphore, #tpu.memory_space<semaphore_mem>> -> memref<!tpu.dma_semaphore, #tpu.memory_space<semaphore_mem>>
    tpu.wait_dma2 semaphore(%76 : memref<!tpu.dma_semaphore, #tpu.memory_space<semaphore_mem>>) src(%73 : memref<1x384xf32, #tpu.memory_space<any>>) dst(%74 : memref<1x384xf32, #tpu.memory_space<vmem>>)
    %c5_i32_52 = arith.constant 5 : i32
    %c0_i32_53 = arith.constant 0 : i32
    %77 = tpu.memref_slice %arg2[%38, %c0_i32_53] : memref<64x384xf32, #tpu.memory_space<any>> -> memref<1x384xf32, #tpu.memory_space<any>>
    %c5_i32_54 = arith.constant 5 : i32
    %c0_i32_55 = arith.constant 0 : i32
    %78 = tpu.memref_slice %arg8[%c5_i32_54, %c0_i32_55] : memref<8x384xf32, #tpu.memory_space<vmem>> -> memref<1x384xf32, #tpu.memory_space<vmem>>
    %79 = tpu.memref_slice %arg9[%c5_i32_52] : memref<8x!tpu.dma_semaphore, #tpu.memory_space<semaphore_mem>> -> memref<1x!tpu.dma_semaphore, #tpu.memory_space<semaphore_mem>>
    %80 = tpu.memref_squeeze %79 : memref<1x!tpu.dma_semaphore, #tpu.memory_space<semaphore_mem>> -> memref<!tpu.dma_semaphore, #tpu.memory_space<semaphore_mem>>
    tpu.wait_dma2 semaphore(%80 : memref<!tpu.dma_semaphore, #tpu.memory_space<semaphore_mem>>) src(%77 : memref<1x384xf32, #tpu.memory_space<any>>) dst(%78 : memref<1x384xf32, #tpu.memory_space<vmem>>)
    %c6_i32_56 = arith.constant 6 : i32
    %c0_i32_57 = arith.constant 0 : i32
    %81 = tpu.memref_slice %arg2[%45, %c0_i32_57] : memref<64x384xf32, #tpu.memory_space<any>> -> memref<1x384xf32, #tpu.memory_space<any>>
    %c6_i32_58 = arith.constant 6 : i32
    %c0_i32_59 = arith.constant 0 : i32
    %82 = tpu.memref_slice %arg8[%c6_i32_58, %c0_i32_59] : memref<8x384xf32, #tpu.memory_space<vmem>> -> memref<1x384xf32, #tpu.memory_space<vmem>>
    %83 = tpu.memref_slice %arg9[%c6_i32_56] : memref<8x!tpu.dma_semaphore, #tpu.memory_space<semaphore_mem>> -> memref<1x!tpu.dma_semaphore, #tpu.memory_space<semaphore_mem>>
    %84 = tpu.memref_squeeze %83 : memref<1x!tpu.dma_semaphore, #tpu.memory_space<semaphore_mem>> -> memref<!tpu.dma_semaphore, #tpu.memory_space<semaphore_mem>>
    tpu.wait_dma2 semaphore(%84 : memref<!tpu.dma_semaphore, #tpu.memory_space<semaphore_mem>>) src(%81 : memref<1x384xf32, #tpu.memory_space<any>>) dst(%82 : memref<1x384xf32, #tpu.memory_space<vmem>>)
    %c7_i32_60 = arith.constant 7 : i32
    %c0_i32_61 = arith.constant 0 : i32
    %85 = tpu.memref_slice %arg2[%52, %c0_i32_61] : memref<64x384xf32, #tpu.memory_space<any>> -> memref<1x384xf32, #tpu.memory_space<any>>
    %c7_i32_62 = arith.constant 7 : i32
    %c0_i32_63 = arith.constant 0 : i32
    %86 = tpu.memref_slice %arg8[%c7_i32_62, %c0_i32_63] : memref<8x384xf32, #tpu.memory_space<vmem>> -> memref<1x384xf32, #tpu.memory_space<vmem>>
    %87 = tpu.memref_slice %arg9[%c7_i32_60] : memref<8x!tpu.dma_semaphore, #tpu.memory_space<semaphore_mem>> -> memref<1x!tpu.dma_semaphore, #tpu.memory_space<semaphore_mem>>
    %88 = tpu.memref_squeeze %87 : memref<1x!tpu.dma_semaphore, #tpu.memory_space<semaphore_mem>> -> memref<!tpu.dma_semaphore, #tpu.memory_space<semaphore_mem>>
    tpu.wait_dma2 semaphore(%88 : memref<!tpu.dma_semaphore, #tpu.memory_space<semaphore_mem>>) src(%85 : memref<1x384xf32, #tpu.memory_space<any>>) dst(%86 : memref<1x384xf32, #tpu.memory_space<vmem>>)
    %c0 = arith.constant 0 : index
    %c0_64 = arith.constant 0 : index
    %89 = vector.load %arg8[%c0, %c0_64] : memref<8x384xf32, #tpu.memory_space<vmem>>, vector<8x384xf32>
    %90 = arith.truncf %89 : vector<8x384xf32> to vector<8x384xbf16>
    %c0_65 = arith.constant 0 : index
    %c0_66 = arith.constant 0 : index
    %91 = vector.load %arg3[%c0_65, %c0_66] : memref<384x128xbf16, #tpu.memory_space<vmem>>, vector<384x128xbf16>
    %cst = arith.constant dense<0.000000e+00> : vector<8x128xf32>
    %92 = tpu.matmul %90, %91, %cst {dimension_numbers = #tpu.dot_dimension_numbers<[1], [0], [0], [1], [0, 0, 1, 1], [], []>} : vector<8x384xbf16>, vector<384x128xbf16>, vector<8x128xf32> -> vector<8x128xf32>
    %c0_67 = arith.constant 0 : index
    %c0_68 = arith.constant 0 : index
    %93 = vector.load %arg4[%c0_67, %c0_68] : memref<1x128xf32, #tpu.memory_space<vmem>>, vector<1x128xf32>
    %94 = vector.broadcast %93 : vector<1x128xf32> to vector<8x128xf32>
    %95 = arith.addf %92, %94 : vector<8x128xf32>
    %cst_69 = arith.constant 0.000000e+00 : f32
    %96 = vector.broadcast %cst_69 : f32 to vector<8x128xf32>
    %97 = arith.maximumf %95, %96 : vector<8x128xf32>
    %98 = arith.truncf %97 : vector<8x128xf32> to vector<8x128xbf16>
    %c0_70 = arith.constant 0 : index
    %c0_71 = arith.constant 0 : index
    %99 = vector.load %arg5[%c0_70, %c0_71] : memref<128x3xbf16, #tpu.memory_space<vmem>>, vector<128x3xbf16>
    %cst_72 = arith.constant dense<0.000000e+00> : vector<8x3xf32>
    %100 = tpu.matmul %98, %99, %cst_72 {dimension_numbers = #tpu.dot_dimension_numbers<[1], [0], [0], [1], [0, 0, 1, 1], [], []>} : vector<8x128xbf16>, vector<128x3xbf16>, vector<8x3xf32> -> vector<8x3xf32>
    %c0_73 = arith.constant 0 : index
    %c0_74 = arith.constant 0 : index
    %101 = vector.load %arg6[%c0_73, %c0_74] : memref<1x3xf32, #tpu.memory_space<vmem>>, vector<1x3xf32>
    %102 = vector.broadcast %101 : vector<1x3xf32> to vector<8x3xf32>
    %103 = arith.addf %100, %102 : vector<8x3xf32>
    %104 = vector.extract_strided_slice %103 {offsets = [0, 0], sizes = [8, 1], strides = [1, 1]} : vector<8x3xf32> to vector<8x1xf32>
    %105 = vector.extract_strided_slice %103 {offsets = [0, 1], sizes = [8, 1], strides = [1, 1]} : vector<8x3xf32> to vector<8x1xf32>
    %106 = vector.extract_strided_slice %103 {offsets = [0, 2], sizes = [8, 1], strides = [1, 1]} : vector<8x3xf32> to vector<8x1xf32>
    %107 = arith.maximumf %104, %105 : vector<8x1xf32>
    %108 = arith.maximumf %107, %106 : vector<8x1xf32>
    %109 = arith.subf %104, %108 : vector<8x1xf32>
    %110 = math.exp %109 : vector<8x1xf32>
    %111 = arith.subf %105, %108 : vector<8x1xf32>
    %112 = math.exp %111 : vector<8x1xf32>
    %113 = arith.subf %106, %108 : vector<8x1xf32>
    %114 = math.exp %113 : vector<8x1xf32>
    %115 = arith.addf %110, %112 : vector<8x1xf32>
    %116 = arith.addf %115, %114 : vector<8x1xf32>
    %117 = tpu.reciprocal %116 {approx = true} : vector<8x1xf32> -> vector<8x1xf32>
    %118 = vector.extract_strided_slice %89 {offsets = [0, 0], sizes = [8, 128], strides = [1, 1]} : vector<8x384xf32> to vector<8x128xf32>
    %119 = vector.extract_strided_slice %89 {offsets = [0, 128], sizes = [8, 128], strides = [1, 1]} : vector<8x384xf32> to vector<8x128xf32>
    %120 = vector.extract_strided_slice %89 {offsets = [0, 256], sizes = [8, 128], strides = [1, 1]} : vector<8x384xf32> to vector<8x128xf32>
    %121 = arith.mulf %110, %117 : vector<8x1xf32>
    %122 = vector.broadcast %121 : vector<8x1xf32> to vector<8x128xf32>
    %123 = arith.mulf %118, %122 : vector<8x128xf32>
    %124 = arith.mulf %112, %117 : vector<8x1xf32>
    %125 = vector.broadcast %124 : vector<8x1xf32> to vector<8x128xf32>
    %126 = arith.mulf %119, %125 : vector<8x128xf32>
    %127 = arith.addf %123, %126 : vector<8x128xf32>
    %128 = arith.mulf %114, %117 : vector<8x1xf32>
    %129 = vector.broadcast %128 : vector<8x1xf32> to vector<8x128xf32>
    %130 = arith.mulf %120, %129 : vector<8x128xf32>
    %131 = arith.addf %127, %130 : vector<8x128xf32>
    %c0_75 = arith.constant 0 : index
    %c0_76 = arith.constant 0 : index
    %132 = vector.load %arg7[%c0_75, %c0_76] : memref<8x128xf32, #tpu.memory_space<vmem>>, vector<8x128xf32>
    tpu.vector_store %arg7[%c0_75, %c0_76], %131 {strides = array<i32>} : memref<8x128xf32, #tpu.memory_space<vmem>>, vector<8x128xf32>,
    return
  }
  func.func @transform_1(%arg0: i32, %arg1: memref<8xi32, #tpu.memory_space<smem>>) -> (i32, i32) {
    %c0_i32 = arith.constant 0 : i32
    %c0_i32_0 = arith.constant 0 : i32
    %c0_i32_1 = arith.constant 0 : i32
    return %c0_i32, %c0_i32_0 : i32, i32
  }
  func.func @transform_2(%arg0: i32, %arg1: memref<8xi32, #tpu.memory_space<smem>>) -> (i32, i32) {
    %c0_i32 = arith.constant 0 : i32
    %c0_i32_0 = arith.constant 0 : i32
    %c0_i32_1 = arith.constant 0 : i32
    return %c0_i32, %c0_i32_0 : i32, i32
  }
  func.func @transform_3(%arg0: i32, %arg1: memref<8xi32, #tpu.memory_space<smem>>) -> (i32, i32) {
    %c0_i32 = arith.constant 0 : i32
    %c0_i32_0 = arith.constant 0 : i32
    %c0_i32_1 = arith.constant 0 : i32
    return %c0_i32, %c0_i32_0 : i32, i32
  }
  func.func @transform_4(%arg0: i32, %arg1: memref<8xi32, #tpu.memory_space<smem>>) -> (i32, i32) {
    %c0_i32 = arith.constant 0 : i32
    %c0_i32_0 = arith.constant 0 : i32
    %c0_i32_1 = arith.constant 0 : i32
    return %c0_i32, %c0_i32_0 : i32, i32
  }
  func.func @transform_5(%arg0: i32, %arg1: memref<8xi32, #tpu.memory_space<smem>>) -> (i32, i32) {
    %c0_i32 = arith.constant 0 : i32
    %c0_i32_0 = arith.constant 0 : i32
    return %arg0, %c0_i32 : i32, i32
  }
}

</mosaic_0001>

<bundles_post_ra>
// kernel: tpu_custom_call.1
= control target key start
LH: loop header
LB: loop body
LE: loop exit
PB: predicated region body
PF: predicated region fallthrough
CT: control target
= control target key end

     0   :  { %s1524_s0 = inlined_call_operand.vmem [shape: s32[8], index: 0, kind: input, shape index: {}]   ;;  %s1525_s1 = inlined_call_operand.hbm [shape: f32[64,384], index: 1, kind: input, shape index: {}]   ;;  %s1526_s2 = inlined_call_operand.hbm [shape: bf16[384,128], index: 2, kind: input, shape index: {}]   ;;  %s1527_s3 = inlined_call_operand.vmem [shape: f32[1,128], index: 3, kind: input, shape index: {}]   ;;  %s1528_s4 = inlined_call_operand.vmem [shape: bf16[128,3], index: 4, kind: input, shape index: {}]   ;;  %s1529_s5 = inlined_call_operand.vmem [shape: f32[1,3], index: 5, kind: input, shape index: {}]   ;;  %s1530_s6 = inlined_call_operand.hbm [shape: f32[8,128], index: 6, kind: output, shape index: {}]  }
   0x1   :  { %1536 = sst [smem:[#allocation29_spill]] %s1530_s6  ;;  %s11_s23 = sshll.u32 %s1524_s0, 4  ;;  %s12_s23 = int_to_ptr.vmem [resolvable:$true] %s11_s23 }
   0x2   :  { %s947_s24 = scalar_lea.vmem %s12_s23, 16  ;;  %p952_p1 = scmp.lt.s32.totalorder %s12_s23, %s12_s23 }
   0x3   :  { %p948_p0 = scmp.ne.s32.totalorder %s12_s23, %s947_s24  ;;  %p953_p2 = scmp.lt.s32.totalorder %s947_s24, %s947_s24 }
   0x5   :  { %p954_p3 = por %p953_p2, %p952_p1 }
   0x7   :  { %p955_p4 = pnand %p954_p3, %p948_p0 }
   0x9   :  { %958 = shalt.err (!%p955_p4)  }
   0xa   :  { %s1217_s25 = smov [#allocation5]  }
   0xb   :  { %14 = dma.vmem_to_smem %s12_s23, 16, %s1217_s25, [#allocation4] }
   0xc   :  { %1195 = dma.done.wait [#allocation4], 16 }
   0xd   :  { %1196 = vsyncadd [#allocation4], 4294967280 }
   0xe   :  { %16 = sfence }
   0xf   :  { %17 = vsyncpa [#allocation7], 0 }
  0x10   :  { %18 = vsyncpa [#allocation8], 0  ;;  %s1218_s26 = smov [#allocation6]   ;;  %s959_s29 = scalar_lea.hbm %s1526_s2, 3072 }
  0x11   :  { %s24_s27 = sshll.u32 %s1218_s26, 4  ;;  %p960_p5 = scmp.ne.s32.totalorder %s1526_s2, %s959_s29  ;;  %s25_s27 = int_to_ptr.vmem [resolvable:$true] %s24_s27 }
  0x12   :  { %p963_p6 = scmp.lt.u32.totalorder %s959_s29, %s1526_s2 }
  0x14   :  { %p965_p7 = pnand %p963_p6, %p960_p5 }
  0x16   :  { %968 = shalt.err (!%p965_p7)
}
  0x17   :  { %s969_s10 = scalar_lea.vmem %s25_s27, 3072  ;;  %p974_p9 = scmp.lt.s32.totalorder %s25_s27, %s25_s27 }
  0x18   :  { %p970_p8 = scmp.ne.s32.totalorder %s25_s27, %s969_s10  ;;  %p975_p10 = scmp.lt.s32.totalorder %s969_s10, %s969_s10 }
  0x1a   :  { %p976_p11 = por %p975_p10, %p974_p9 }
  0x1c   :  { %p977_p12 = pnand %p976_p11, %p970_p8 }
  0x1e   :  { %980 = shalt.err (!%p977_p12)
}
  0x1f   :  { %s1219_s11 = smov 64   ;;  %s1220_s12 = smov 4  }
  0x20   :  { %30 = dma.hbm_to_vmem [thread:$0]  %s1526_s2, 3072, %s25_s27, [#allocation7], %s1219_s11, %s1219_s11, %s1220_s12  }
  0x21   :  { %1197 = dma.done.wait [#allocation7], 3072  }
  0x22   :  { %1198 = vsyncadd [#allocation7], 4294964224  ;;  %s42_s15 = sld [smem:[#allocation5]]  ;;  %s1221_s16 = smov [#allocation2]  }
  0x23   :  { %s50_s17 = sshll.u32 %s1221_s16, 4  ;;  %s744_s18 = sld [smem:[#allocation5 + $0x1]]  ;;  %s1290_s17 = int_to_ptr.vmem [resolvable:$true] %s50_s17 }
  0x24   :  { %s1222_s19 = smov [#allocation2 + $0x1]   ;;  %s1292_s21 = sld [smem:[#allocation5 + $0x2]] }
  0x25   :  { %s65_s20 = sshll.u32 %s1222_s19, 4  ;;  %s1223_s22 = smov [#allocation2 + $0x2]   ;;  %s1294_s20 = int_to_ptr.vmem [resolvable:$true] %s65_s20 }
  0x26   :  { %s80_s23 = sshll.u32 %s1223_s22, 4  ;;  %s1296_s24 = sld [smem:[#allocation5 + $0x3]]  ;;  %s1298_s23 = int_to_ptr.vmem [resolvable:$true] %s80_s23 }
  0x28   :  { %s43_s2 = sshrl.u32 %s42_s15, 3  ;;  %s44_s25 = sand.u32 7, %s42_s15  }
  0x29   :  { %s45_s26 = smul.u32 24, %s43_s2  ;;  %s56_s27 = sshrl.u32 %s744_s18, 3 }
  0x2a   :  { %s57_s28 = sand.u32 7, %s744_s18   ;;  %s58_s29 = smul.u32 24, %s56_s27 }
  0x2b   :  { %s46_s0 = sadd.s32 %s45_s26, %s44_s25  ;;  %s71_s7 = sshrl.u32 %s1292_s21, 3 }
  0x2c   :  { %s743_s30 = sshll.u32 %s46_s0, 4  ;;  %s59_s11 = sadd.s32 %s58_s29, %s57_s28 }
  0x2d   :  { %s48_s10 = scalar_lea.hbm %s1525_s1, %s743_s30  ;;  %s1307_s15 = scalar_lea.hbm %s1525_s1, 3072 }
  0x2e   :  { %s981_s12 = scalar_lea.hbm %s48_s10, 48  ;;  %p984_p0 = scmp.lt.u32.totalorder %s48_s10, %s1525_s1 }
  0x2f   :  { %p982_p13 = scmp.ne.s32.totalorder %s48_s10, %s981_s12  ;;  %p985_p1 = scmp.lt.u32.totalorder %s1307_s15, %s981_s12 }
  0x30   :  { %p987_p3 = scmp.lt.u32.totalorder %s981_s12, %s48_s10 }
  0x31   :  { %p986_p2 = por %p985_p1, %p984_p0 }
  0x33   :  { %p988_p4 = por %p987_p3, %p986_p2 }
  0x35   :  { %p989_p5 = pnand %p988_p4, %p982_p13 }
  0x37   :  { %992 = shalt.err (!%p989_p5)  }
  0x38   :  { %s993_s18 = scalar_lea.vmem %s1290_s17, 48  ;;  %s1316_s22 = scalar_lea.vmem %s1290_s17, 384 }
  0x39   :  { %p994_p6 = scmp.ne.s32.totalorder %s1290_s17, %s993_s18  ;;  %p998_p7 = scmp.lt.s32.totalorder %s1290_s17, %s1290_s17 }
  0x3a   :  { %p999_p8 = scmp.lt.s32.totalorder %s1316_s22, %s993_s18 }
  0x3c   :  { %p1000_p9 = por %p999_p8, %p998_p7 }
  0x3e   :  { %p1001_p10 = pnand %p1000_p9, %p994_p6 }
  0x40   :  { %1004 = shalt.err (!%p1001_p10)  }
  0x41   :  { %s1531_s2 = smov 128   ;;  %s1533_s25 = smov 1  }
  0x42   :  { %53 = dma.hbm_to_vmem [thread:$0]  %s48_s10, 48, %s1290_s17, [#allocation3], %s1531_s2, %s1531_s2, %s1533_s25 }
  0x43   :  { %s745_s26 = sshll.u32 %s59_s11, 4  ;;  %s72_s27 = sand.u32 7, %s1292_s21  }
  0x44   :  { %s61_s29 = scalar_lea.hbm %s1525_s1, %s745_s26  ;;  %s73_s30 = smul.u32 24, %s71_s7 }
  0x45   :  { %s1005_s8 = scalar_lea.hbm %s61_s29, 48  ;;  %p1008_p12 = scmp.lt.u32.totalorder %s61_s29, %s1525_s1 }
  0x46   :  { %p1006_p11 = scmp.ne.s32.totalorder %s61_s29, %s1005_s8  ;;  %p1009_p13 = scmp.lt.u32.totalorder %s1307_s15, %s1005_s8 }
  0x47   :  { %p1011_p1 = scmp.lt.u32.totalorder %s1005_s8, %s61_s29 }
  0x48   :  { %p1010_p0 = por %p1009_p13, %p1008_p12 }
  0x4a   :  { %p1012_p2 = por %p1011_p1, %p1010_p0 }
  0x4c   :  { %p1013_p3 = pnand %p1012_p2, %p1006_p11 }
  0x4e   :  { %1016 = shalt.err (!%p1013_p3)  }
  0x4f   :  { %s1017_s21 = scalar_lea.vmem %s1294_s20, 48  ;;  %p1022_p5 = scmp.lt.s32.totalorder %s1294_s20, %s1290_s17 }
  0x50   :  { %p1018_p4 = scmp.ne.s32.totalorder %s1294_s20, %s1017_s21  ;;  %p1023_p6 = scmp.lt.s32.totalorder %s1316_s22, %s1017_s21 }
  0x52   :  { %p1024_p7 = por %p1023_p6, %p1022_p5 }
  0x54   :  { %p1025_p8 = pnand %p1024_p7, %p1018_p4 }
  0x56   :  { %1028 = shalt.err (!%p1025_p8)  }
  0x57   :  { %68 = dma.hbm_to_vmem [thread:$0]  %s61_s29, 48, %s1294_s20, [#allocation3 + $0x1], %s1531_s2, %s1531_s2, %s1533_s25 }
  0x58   :  { %s74_s7 = sadd.s32 %s73_s30, %s72_s27  ;;  %s86_s10 = sshrl.u32 %s1296_s24, 3 }
  0x59   :  { %s747_s11 = sshll.u32 %s74_s7, 4  ;;  %s87_s13 = sand.u32 7, %s1296_s24  }
  0x5a   :  { %s76_s19 = scalar_lea.hbm %s1525_s1, %s747_s11  ;;  %s88_s18 = smul.u32 24, %s86_s10 }
  0x5b   :  { %s1029_s26 = scalar_lea.hbm %s76_s19, 48  ;;  %p1032_p10 = scmp.lt.u32.totalorder %s76_s19, %s1525_s1 }
  0x5c   :  { %p1030_p9 = scmp.ne.s32.totalorder %s76_s19, %s1029_s26  ;;  %p1033_p11 = scmp.lt.u32.totalorder %s1307_s15, %s1029_s26 }
  0x5d   :  { %p1035_p13 = scmp.lt.u32.totalorder %s1029_s26, %s76_s19 }
  0x5e   :  { %p1034_p12 = por %p1033_p11, %p1032_p10 }
  0x60   :  { %p1036_p0 = por %p1035_p13, %p1034_p12 }
  0x62   :  { %p1037_p1 = pnand %p1036_p0, %p1030_p9 }
  0x64   :  { %1040 = shalt.err (!%p1037_p1)  }
  0x65   :  { %s1041_s20 = scalar_lea.vmem %s1298_s23, 48  ;;  %p1046_p3 = scmp.lt.s32.totalorder %s1298_s23, %s1290_s17 }
  0x66   :  { %p1042_p2 = scmp.ne.s32.totalorder %s1298_s23, %s1041_s20  ;;  %p1047_p4 = scmp.lt.s32.totalorder %s1316_s22, %s1041_s20 }
  0x68   :  { %p1048_p5 = por %p1047_p4, %p1046_p3 }
  0x6a   :  { %p1049_p6 = pnand %p1048_p5, %p1042_p2 }
  0x6c   :  { %1052 = shalt.err (!%p1049_p6)  }
  0x6d   :  { %83 = dma.hbm_to_vmem [thread:$0]  %s76_s19, 48, %s1298_s23, [#allocation3 + $0x2], %s1531_s2, %s1531_s2, %s1533_s25 }
  0x6e   :  { %s89_s24 = sadd.s32 %s88_s18, %s87_s13  ;;  %s1226_s29 = smov [#allocation2 + $0x3]  }
  0x6f   :  { %s749_s27 = sshll.u32 %s89_s24, 4  ;;  %s95_s30 = sshll.u32 %s1226_s29, 4  ;;  %s96_s30 = int_to_ptr.vmem [resolvable:$true] %s95_s30 }
  0x70   :  { %s91_s12 = scalar_lea.hbm %s1525_s1, %s749_s27 }
  0x71   :  { %s1053_s21 = scalar_lea.hbm %s91_s12, 48  ;;  %p1056_p8 = scmp.lt.u32.totalorder %s91_s12, %s1525_s1 }
  0x72   :  { %p1054_p7 = scmp.ne.s32.totalorder %s91_s12, %s1053_s21  ;;  %p1057_p9 = scmp.lt.u32.totalorder %s1307_s15, %s1053_s21 }
  0x73   :  { %p1059_p11 = scmp.lt.u32.totalorder %s1053_s21, %s91_s12 }
  0x74   :  { %p1058_p10 = por %p1057_p9, %p1056_p8 }
  0x76   :  { %p1060_p12 = por %p1059_p11, %p1058_p10 }
  0x78   :  { %p1061_p13 = pnand %p1060_p12, %p1054_p7 }
  0x7a   :  { %1064 = shalt.err (!%p1061_p13)  }
  0x7b   :  { %s1065_s23 = scalar_lea.vmem %s96_s30, 48  ;;  %p1070_p1 = scmp.lt.s32.totalorder %s96_s30, %s1290_s17 }
  0x7c   :  { %p1066_p0 = scmp.ne.s32.totalorder %s96_s30, %s1065_s23  ;;  %p1071_p2 = scmp.lt.s32.totalorder %s1316_s22, %s1065_s23 }
  0x7e   :  { %p1072_p3 = por %p1071_p2, %p1070_p1 }
  0x80   :  { %p1073_p4 = pnand %p1072_p3, %p1066_p0 }
  0x82   :  { %1076 = shalt.err (!%p1073_p4)  }
  0x83   :  { %98 = dma.hbm_to_vmem [thread:$0]  %s91_s12, 48, %s96_s30, [#allocation3 + $0x3], %s1531_s2, %s1531_s2, %s1533_s25 }
  0x84   :  { %s750_s11 = sld [smem:[#allocation5 + $0x4]]  ;;  %s1227_s13 = smov [#allocation2 + $0x4]  }
  0x85   :  { %s110_s14 = sshll.u32 %s1227_s13, 4  ;;  %s752_s16 = sld [smem:[#allocation5 + $0x5]]  ;;  %s1372_s14 = int_to_ptr.vmem [resolvable:$true] %s110_s14 }
  0x86   :  { %s1228_s19 = smov [#allocation2 + $0x5]   ;;  %s1374_s26 = sld [smem:[#allocation5 + $0x6]] }
  0x87   :  { %s125_s18 = sshll.u32 %s1228_s19, 4  ;;  %s1229_s28 = smov [#allocation2 + $0x6]   ;;  %s1376_s18 = int_to_ptr.vmem [resolvable:$true] %s125_s18 }
  0x88   :  { %s1378_s0 = sshll.u32 %s1229_s28, 4  ;;  %s1380_s20 = sld [smem:[#allocation5 + $0x7]]  ;;  %s141_s0 = int_to_ptr.vmem [resolvable:$true] %s1378_s0 }
  0x8a   :  { %s101_s24 = sshrl.u32 %s750_s11, 3  ;;  %s102_s27 = sand.u32 7, %s750_s11  }
  0x8b   :  { %s103_s29 = smul.u32 24, %s101_s24  ;;  %s116_s30 = sshrl.u32 %s752_s16, 3 }
  0x8c   :  { %s117_s8 = sand.u32 7, %s752_s16   ;;  %s118_s9 = smul.u32 24, %s116_s30 }
  0x8d   :  { %s104_s12 = sadd.s32 %s103_s29, %s102_s27  ;;  %s131_s21 = sshrl.u32 %s1374_s26, 3 }
  0x8e   :  { %s751_s7 = sshll.u32 %s104_s12, 4  ;;  %s119_s10 = sadd.s32 %s118_s9, %s117_s8 }
  0x8f   :  { %s106_s19 = scalar_lea.hbm %s1525_s1, %s751_s7  ;;  %s753_s2 = sshll.u32 %s119_s10, 4 }
  0x90   :  { %s1077_s28 = scalar_lea.hbm %s106_s19, 48  ;;  %p1080_p6 = scmp.lt.u32.totalorder %s106_s19, %s1525_s1 }
  0x91   :  { %p1078_p5 = scmp.ne.s32.totalorder %s106_s19, %s1077_s28  ;;  %p1081_p7 = scmp.lt.u32.totalorder %s1307_s15, %s1077_s28 }
  0x92   :  { %p1083_p9 = scmp.lt.u32.totalorder %s1077_s28, %s106_s19 }
  0x93   :  { %p1082_p8 = por %p1081_p7, %p1080_p6 }
  0x95   :  { %p1084_p10 = por %p1083_p9, %p1082_p8 }
  0x97   :  { %p1085_p11 = pnand %p1084_p10, %p1078_p5 }
  0x99   :  { %1088 = shalt.err (!%p1085_p11)  }
  0x9a   :  { %s1089_s11 = scalar_lea.vmem %s1372_s14, 48  ;;  %p1094_p13 = scmp.lt.s32.totalorder %s1372_s14, %s1290_s17 }
  0x9b   :  { %p1090_p12 = scmp.ne.s32.totalorder %s1372_s14, %s1089_s11  ;;  %p1095_p0 = scmp.lt.s32.totalorder %s1316_s22, %s1089_s11 }
  0x9d   :  { %p1096_p1 = por %p1095_p0, %p1094_p13 }
  0x9f   :  { %p1097_p2 = pnand %p1096_p1, %p1090_p12 }
  0xa1   :  { %1100 = shalt.err (!%p1097_p2)  }
  0xa2   :  { %s1537_s6 = smov 1   ;;  %s1538_s25 = smov 128  }
  0xa3   :  { %113 = dma.hbm_to_vmem [thread:$0]  %s106_s19, 48, %s1372_s14, [#allocation3 + $0x4], %s1538_s25, %s1538_s25, %s1537_s6 }
  0xa4   :  { %s121_s27 = scalar_lea.hbm %s1525_s1, %s753_s2  ;;  %s132_s29 = sand.u32 7, %s1374_s26  }
  0xa5   :  { %s1101_s30 = scalar_lea.hbm %s121_s27, 48  ;;  %p1104_p4 = scmp.lt.u32.totalorder %s121_s27, %s1525_s1 }
  0xa6   :  { %p1102_p3 = scmp.ne.s32.totalorder %s121_s27, %s1101_s30  ;;  %p1105_p5 = scmp.lt.u32.totalorder %s1307_s15, %s1101_s30 }
  0xa7   :  { %p1107_p7 = scmp.lt.u32.totalorder %s1101_s30, %s121_s27 }
  0xa8   :  { %p1106_p6 = por %p1105_p5, %p1104_p4 }
  0xaa   :  { %p1108_p8 = por %p1107_p7, %p1106_p6 }
  0xac   :  { %p1109_p9 = pnand %p1108_p8, %p1102_p3 }
  0xae   :  { %1112 = shalt.err (!%p1109_p9)  }
  0xaf   :  { %s1113_s14 = scalar_lea.vmem %s1376_s18, 48  ;;  %p1118_p11 = scmp.lt.s32.totalorder %s1376_s18, %s1290_s17 }
  0xb0   :  { %p1114_p10 = scmp.ne.s32.totalorder %s1376_s18, %s1113_s14  ;;  %p1119_p12 = scmp.lt.s32.totalorder %s1316_s22, %s1113_s14 }
  0xb2   :  { %p1120_p13 = por %p1119_p12, %p1118_p11 }
  0xb4   :  { %p1121_p0 = pnand %p1120_p13, %p1114_p10 }
  0xb6   :  { %1124 = shalt.err (!%p1121_p0)  }
  0xb7   :  { %128 = dma.hbm_to_vmem [thread:$0]  %s121_s27, 48, %s1376_s18, [#allocation3 + $0x5], %s1538_s25, %s1538_s25, %s1537_s6 }
  0xb8   :  { %s133_s2 = smul.u32 24, %s131_s21  ;;  %s146_s12 = sshrl.u32 %s1380_s20, 3 }
  0xb9   :  { %s147_s7 = sand.u32 7, %s1380_s20   ;;  %s148_s23 = smul.u32 24, %s146_s12 }
  0xba   :  { %s134_s10 = sadd.s32 %s133_s2, %s132_s29 }
  0xbb   :  { %s755_s13 = sshll.u32 %s134_s10, 4  ;;  %s149_s16 = sadd.s32 %s148_s23, %s147_s7 }
  0xbc   :  { %s136_s11 = scalar_lea.hbm %s1525_s1, %s755_s13 }
  0xbd   :  { %s1125_s24 = scalar_lea.hbm %s136_s11, 48  ;;  %p1128_p2 = scmp.lt.u32.totalorder %s136_s11, %s1525_s1 }
  0xbe   :  { %p1126_p1 = scmp.ne.s32.totalorder %s136_s11, %s1125_s24  ;;  %p1129_p3 = scmp.lt.u32.totalorder %s1307_s15, %s1125_s24 }
  0xbf   :  { %p1131_p5 = scmp.lt.u32.totalorder %s1125_s24, %s136_s11 }
  0xc0   :  { %p1130_p4 = por %p1129_p3, %p1128_p2 }
  0xc2   :  { %p1132_p6 = por %p1131_p5, %p1130_p4 }
  0xc4   :  { %p1133_p7 = pnand %p1132_p6, %p1126_p1 }
  0xc6   :  { %1136 = shalt.err (!%p1133_p7)  }
  0xc7   :  { %s1137_s18 = scalar_lea.vmem %s141_s0, 48  ;;  %p1142_p9 = scmp.lt.s32.totalorder %s141_s0, %s1290_s17 }
  0xc8   :  { %p1138_p8 = scmp.ne.s32.totalorder %s141_s0, %s1137_s18  ;;  %p1143_p10 = scmp.lt.s32.totalorder %s1316_s22, %s1137_s18 }
  0xca   :  { %p1144_p11 = por %p1143_p10, %p1142_p9 }
  0xcc   :  { %p1145_p12 = pnand %p1144_p11, %p1138_p8 }
  0xce   :  { %1148 = shalt.err (!%p1145_p12)  }
  0xcf   :  { %143 = dma.hbm_to_vmem [thread:$0]  %s136_s11, 48, %s141_s0, [#allocation3 + $0x6], %s1538_s25, %s1538_s25, %s1537_s6 }
  0xd0   :  { %s757_s26 = sshll.u32 %s149_s16, 4  ;;  %s1230_s20 = smov [#allocation2 + $0x7]  }
  0xd1   :  { %s155_s21 = sshll.u32 %s1230_s20, 4  ;;  %s151_s9 = scalar_lea.hbm %s1525_s1, %s757_s26  ;;  %s156_s21 = int_to_ptr.vmem [resolvable:$true] %s155_s21 }
  0xd2   :  { %s1149_s14 = scalar_lea.hbm %s151_s9, 48  ;;  %p1152_p0 = scmp.lt.u32.totalorder %s151_s9, %s1525_s1 }
  0xd3   :  { %p1150_p13 = scmp.ne.s32.totalorder %s151_s9, %s1149_s14  ;;  %p1153_p1 = scmp.lt.u32.totalorder %s1307_s15, %s1149_s14 }
  0xd4   :  { %p1155_p3 = scmp.lt.u32.totalorder %s1149_s14, %s151_s9 }
  0xd5   :  { %p1154_p2 = por %p1153_p1, %p1152_p0 }
  0xd7   :  { %p1156_p4 = por %p1155_p3, %p1154_p2 }
  0xd9   :  { %p1157_p5 = pnand %p1156_p4, %p1150_p13 }
  0xdb   :  { %1160 = shalt.err (!%p1157_p5)  }
  0xdc   :  { %s1161_s0 = scalar_lea.vmem %s156_s21, 48  ;;  %p1166_p7 = scmp.lt.s32.totalorder %s156_s21, %s1290_s17 }
  0xdd   :  { %p1162_p6 = scmp.ne.s32.totalorder %s156_s21, %s1161_s0  ;;  %p1167_p8 = scmp.lt.s32.totalorder %s1316_s22, %s1161_s0 }
  0xdf   :  { %p1168_p9 = por %p1167_p8, %p1166_p7 }
  0xe1   :  { %p1169_p10 = pnand %p1168_p9, %p1162_p6 }
  0xe3   :  { %1172 = shalt.err (!%p1169_p10)  }
  0xe4   :  { %158 = dma.hbm_to_vmem [thread:$0]  %s151_s9, 48, %s156_s21, [#allocation3 + $0x7], %s1538_s25, %s1538_s25, %s1537_s6 }
  0xe5   :  { %1199 = dma.done.wait [#allocation3], 48 }
  0xe6   :  { %1200 = vsyncadd [#allocation3], 4294967248 }
  0xe7   :  { %1201 = dma.done.wait [#allocation3 + $0x1], 48 }
  0xe8   :  { %1202 = vsyncadd [#allocation3 + $0x1], 4294967248 }
  0xe9   :  { %1203 = dma.done.wait [#allocation3 + $0x2], 48 }
  0xea   :  { %1204 = vsyncadd [#allocation3 + $0x2], 4294967248 }
  0xeb   :  { %1205 = dma.done.wait [#allocation3 + $0x3], 48 }
  0xec   :  { %1206 = vsyncadd [#allocation3 + $0x3], 4294967248 }
  0xed   :  { %1207 = dma.done.wait [#allocation3 + $0x4], 48 }
  0xee   :  { %1208 = vsyncadd [#allocation3 + $0x4], 4294967248 }
  0xef   :  { %1209 = dma.done.wait [#allocation3 + $0x5], 48 }
  0xf0   :  { %1210 = vsyncadd [#allocation3 + $0x5], 4294967248 }
  0xf1   :  { %1211 = dma.done.wait [#allocation3 + $0x6], 48 }
  0xf2   :  { %1212 = vsyncadd [#allocation3 + $0x6], 4294967248 }
  0xf3   :  { %1213 = dma.done.wait [#allocation3 + $0x7], 48 }
  0xf4   :  { %1214 = vsyncadd [#allocation3 + $0x7], 4294967248  ;;  %v1231_v0 = vmov 0.0   ;;  %vm1232_vm0 = vmmov 0   ;;  %v907_v1 = vld [vmem:[#allocation6 + $0x40] sm:$0xff]   ;;  %v910_v4 = vld [vmem:[#allocation6 + $0x48] sm:$0xff]  }
  0xf5   :  { %840 = vmatprep.subr.bf16.mxu1 %v1231_v0  ;;  %856 = vmatprep.mubr.msk.bf16.mxu1 %vm1232_vm0, %v1231_v0  ;;  %v908_v2 = vld [vmem:[#allocation6] sm:$0xff]   ;;  %v911_v5 = vld [vmem:[#allocation6 + $0x8] sm:$0xff]   ;;  %v913_v7 = vld [vmem:[#allocation6 + $0x50] sm:$0xff]   ;;  %s1234_s21 = smov 126   ;;  %s1235_s27 = smov 2  }
  0xf6   :  { %800 = vmatprep.subr.bf16.mxu0 %v907_v1  ;;  %v909_v3 = vld [vmem:[#allocation6 + $0x80] sm:$0xff]   ;;  %v912_v6 = vld [vmem:[#allocation6 + $0x88] sm:$0xff]   ;;  %v914_v8 = vld [vmem:[#allocation6 + $0x10] sm:$0xff]  }
  0xf7   :  { %801 = vmatpush3.bf16.msra.mxu0 %v908_v2  ;;  %841 = vmatpush3.bf16.msra.mxu1 %v909_v3  ;;  %v915_v9 = vld [vmem:[#allocation6 + $0x90] sm:$0xff]   ;;  %v916_v10 = vld [vmem:[#allocation6 + $0x58] sm:$0xff]   ;;  %v919_v13 = vld [vmem:[#allocation6 + $0x60] sm:$0xff]  }
  0xf8   :  { %802 = vmatprep.subr.bf16.mxu0 %v910_v4  ;;  %842 = vmatprep.subr.bf16.mxu1 %v1231_v0  ;;  %v917_v11 = vld [vmem:[#allocation6 + $0x18] sm:$0xff]   ;;  %v920_v14 = vld [vmem:[#allocation6 + $0x20] sm:$0xff]   ;;  %v922_v16 = vld [vmem:[#allocation6 + $0x68] sm:$0xff]  }
  0xf9   :  { %v918_v12 = vld [vmem:[#allocation6 + $0x98] sm:$0xff]   ;;  %v921_v15 = vld [vmem:[#allocation6 + $0xa0] sm:$0xff]   ;;  %v923_v17 = vld [vmem:[#allocation6 + $0x28] sm:$0xff]  }
  0xfa   :  { %v924_v18 = vld [vmem:[#allocation6 + $0xa8] sm:$0xff]   ;;  %v925_v19 = vld [vmem:[#allocation6 + $0x70] sm:$0xff]   ;;  %v928_v23 = vld [vmem:[#allocation6 + $0x78] sm:$0xff]  }
  0xfb   :  { %803 = vmatpush3.bf16.msra.mxu0 %v911_v5  ;;  %843 = vmatpush3.bf16.msra.mxu1 %v912_v6  ;;  %v926_v20 = vld [vmem:[#allocation6 + $0x30] sm:$0xff]   ;;  %v929_v25 = vld [vmem:[#allocation6 + $0x38] sm:$0xff]   ;;  %v1458_v27 = vld [vmem:[#allocation2] sm:$0xff] }
  0xfc   :  { %804 = vmatprep.subr.bf16.mxu0 %v913_v7  ;;  %844 = vmatprep.subr.bf16.mxu1 %v1231_v0  ;;  %v1453_v21 = vld [vmem:[#allocation2 + $0x8] sm:$0xff]  ;;  %v930_v26 = vld [vmem:[#allocation6 + $0xb8] sm:$0xff]   ;;  %v931_v29 = vld [vmem:[%s1528_s4] sm:$0xff]   ;;  %v179_v30 = vpack.c.bf16 %v1458_v27, %v1458_v27  ;;  %v1236_v7 = vmov 0  }
  0xfd   :  { %v927_v22 = vld [vmem:[#allocation6 + $0xb0] sm:$0xff]   ;;  %v180_v24 = vpack.c.bf16 %v1453_v21, %v1453_v21  ;;  %v1460_v28 = vld [vmem:[#allocation2 + $0x10] sm:$0xff]  ;;  %v934_v34 = vld [vmem:[%s1528_s4 + $0x18] sm:$0xff]   ;;  %903 = vset.pattern.permute.xlu0 %v1236_v7 }
  0xfe   :  { %v181_v31 = vpack.c.bf16 %v1460_v28, %v1460_v28  ;;  %v932_v32 = vld [vmem:[%s1528_s4 + $0x8] sm:$0xff]   ;;  %v933_v33 = vld [vmem:[%s1528_s4 + $0x10] sm:$0xff]   ;;  %v935_v35 = vld [vmem:[%s1528_s4 + $0x20] sm:$0xff]  }
  0xff   :  { %805 = vmatpush3.bf16.msra.mxu0 %v914_v8  ;;  %845 = vmatpush3.bf16.msra.mxu1 %v915_v9  ;;  %v936_v36 = vld [vmem:[%s1528_s4 + $0x28] sm:$0xff]   ;;  %v937_v37 = vld [vmem:[%s1528_s4 + $0x30] sm:$0xff]   ;;  %v938_v38 = vld [vmem:[%s1528_s4 + $0x38] sm:$0xff]  }
 0x100   :  { %806 = vmatprep.subr.bf16.mxu0 %v916_v10  ;;  %846 = vmatprep.subr.bf16.mxu1 %v1231_v0  ;;  %v758_v41 = vld [vmem:[%s1527_s3] ss:$0 sm:$0xff]  ;;  %s1233_s3 = smov 127  }
 0x101   :  { %413 = vmatprep.mubr.bf16.mxu0 %v180_v24  ;;  %v783_v53 = vld [vmem:[%s1529_s5] ss:$0 sm:$0xff]  ;;  %s1239_s5 = smov [#allocation9]  }
 0x103   :  { %807 = vmatpush3.bf16.msra.mxu0 %v917_v11  ;;  %847 = vmatpush3.bf16.msra.mxu1 %v918_v12 }
 0x104   :  { %808 = vmatprep.subr.bf16.mxu0 %v919_v13  ;;  %848 = vmatprep.subr.bf16.mxu1 %v1231_v0 }
 0x107   :  { %809 = vmatpush3.bf16.msra.mxu0 %v920_v14  ;;  %849 = vmatpush3.bf16.msra.mxu1 %v921_v15  ;;  %v1237_v15 = vmov 1  }
 0x108   :  { %810 = vmatprep.subr.bf16.mxu0 %v922_v16  ;;  %850 = vmatprep.subr.bf16.mxu1 %v1231_v0 }
 0x109   :  { %904 = vset.pattern.permute.xlu1 %v1237_v15 }
 0x10b   :  { %811 = vmatpush3.bf16.msra.mxu0 %v923_v17  ;;  %851 = vmatpush3.bf16.msra.mxu1 %v924_v18  ;;  %v1238_v18 = vmov 2  }
 0x10c   :  { %812 = vmatprep.subr.bf16.mxu0 %v925_v19  ;;  %852 = vmatprep.subr.bf16.mxu1 %v1231_v0 }
 0x10f   :  { %813 = vmatpush3.bf16.msra.mxu0 %v926_v20  ;;  %853 = vmatpush3.bf16.msra.mxu1 %v927_v22 }
 0x110   :  { %814 = vmatprep.subr.bf16.mxu0 %v928_v23  ;;  %854 = vmatprep.subr.bf16.mxu1 %v1231_v0 }
 0x113   :  { %815 = vmatpush3.bf16.msra.mxu0 %v929_v25  ;;  %855 = vmatpush3.bf16.msra.mxu1 %v930_v26 }
 0x114   :  { %860 = vmatprep.subr.bf16.mxu0 %v1231_v0 }
 0x116   :  { %414 = vmatmul.mubr.bf16.vlgmr.msra.gmra.mrb[0].mxu0 %v179_v30  ;;  %857 = vmatmul.mubr.bf16.vlgmr.msra.gmra.mrb[0].mxu1 %v181_v31 }
 0x117   :  { %861 = vmatpush3.bf16.msra.mxu0 %v931_v29  ;;  %876 = vmatprep.mubr.msk.bf16.mxu0 %vm1232_vm0, %v1231_v0 }
 0x118   :  { %862 = vmatprep.subr.bf16.mxu0 %v1231_v0 }
 0x11b   :  { %863 = vmatpush3.bf16.msra.mxu0 %v932_v32 }
 0x11c   :  { %864 = vmatprep.subr.bf16.mxu0 %v1231_v0 }
 0x11f   :  { %865 = vmatpush3.bf16.msra.mxu0 %v933_v33 }
 0x120   :  { %866 = vmatprep.subr.bf16.mxu0 %v1231_v0 }
 0x123   :  { %867 = vmatpush3.bf16.msra.mxu0 %v934_v34 }
 0x124   :  { %868 = vmatprep.subr.bf16.mxu0 %v1231_v0 }
 0x127   :  { %869 = vmatpush3.bf16.msra.mxu0 %v935_v35 }
 0x128   :  { %870 = vmatprep.subr.bf16.mxu0 %v1231_v0 }
 0x12b   :  { %871 = vmatpush3.bf16.msra.mxu0 %v936_v36 }
 0x12c   :  { %872 = vmatprep.subr.bf16.mxu0 %v1231_v0 }
 0x12f   :  { %873 = vmatpush3.bf16.msra.mxu0 %v937_v37 }
 0x130   :  { %874 = vmatprep.subr.bf16.mxu0 %v1231_v0 }
 0x133   :  { %875 = vmatpush3.bf16.msra.mxu0 %v938_v38 }
 0x1e9   :  { %v816_v39 = vpop.f32.mrb[0].mxu0  ;;  %v455_v42 = vpop.f32.mrb[0].mxu1 }
 0x1ea   :  { %v817_v40 = vpop.f32.mrb[1].mxu0  ;;  %v858_v45 = vpop.f32.mrb[1].mxu1 }
 0x1eb   :  { %v818_v43 = vadd.f32 %v817_v40, %v816_v39  ;;  %v819_v44 = vpop.f32.mrb[2].mxu0  ;;  %v458_v47 = vpop.f32.mrb[2].mxu1 }
 0x1ec   :  { %v820_v46 = vpop.f32.mrb[3].mxu0  ;;  %v859_v49 = vpop.f32.mrb[3].mxu1 }
 0x1ed   :  { %v416_v48 = vadd.f32 %v818_v43, %v758_v41 }
 0x1ef   :  { %v456_v50 = vadd.f32 %v455_v42, %v416_v48 }
 0x1f1   :  { %v461_v51 = vmax.f32 %v456_v50, 0.0 }
 0x1f3   :  { %v462_v52 = vpack.c.bf16 %v461_v51, %v461_v51 }
 0x1f5   :  { %877 = vmatmul.mubr.bf16.vlgmr.msra.gmra.mrb[4].mxu0 %v462_v52 }
 0x2c8   :  { %v568_v54 = vpop.f32.mrb[4].mxu0 }
 0x2c9   :  { %v569_v55 = vadd.f32 %v783_v53, %v568_v54  ;;  %v878_v56 = vpop.f32.mrb[5].mxu0 }
 0x2ca   :  { %v571_v57 = vpop.f32.mrb[6].mxu0 }
 0x2cb   :  { %575 = vrot.lane.b32.xlu0 %v569_v55, %s1233_s3  ;;  %v879_v58 = vpop.f32.mrb[7].mxu0 }
 0x2cf   :  { %579 = vrot.lane.b32.xlu0 %v569_v55, %s1234_s21 }
 0x33d   :  { %v576_v59 = vpop.permute.xlu0 %575 }
 0x33e   :  { %v578_v60 = vmax.f32 %v569_v55, %v576_v59 }
 0x341   :  { %v580_v61 = vpop.permute.xlu0 %579 }
 0x342   :  { %v582_v62 = vmax.f32 %v578_v60, %v580_v61 }
 0x344   :  { %587 = vrot.lane.b32.xlu1 %v582_v62, %s1537_s6  ;;  %v583_v8 = vsub.f32 %v569_v55, %v582_v62 }
 0x346   :  { %v584_v9 = vmul.f32 1.442695, %v583_v8 }
 0x348   :  { %593 = vrot.lane.b32.xlu1 %v582_v62, %s1235_s27 }
 0x3b6   :  { %v588_v63 = vpop.permute.xlu1 %587 }
 0x3b7   :  { %v590_v0 = vsub.f32 %v569_v55, %v588_v63 }
 0x3b9   :  { %v591_v1 = vmul.f32 1.442695, %v590_v0 }
 0x3ba   :  { %v594_v2 = vpop.permute.xlu1 %593 }
 0x3bb   :  { %939 = vpow2.f32 %v591_v1  ;;  %v596_v3 = vsub.f32 %v569_v55, %v594_v2 }
 0x3bd   :  { %v597_v4 = vmul.f32 1.442695, %v596_v3 }
 0x3bf   :  { %941 = vpow2.f32 %v597_v4 }
 0x3c0   :  { %943 = vpow2.f32 %v584_v9 }
 0x3c5   :  { %v940_v5 = vpop.eup %939 }
 0x3c6   :  { %600 = vrot.lane.b32.xlu0 %v940_v5, %s1233_s3 }
 0x3c9   :  { %v942_v6 = vpop.eup %941 }
 0x3ca   :  { %605 = vrot.lane.b32.xlu1 %v942_v6, %s1234_s21  ;;  %v944_v11 = vpop.eup %943 }
 0x438   :  { %v601_v10 = vpop.permute.xlu0 %600 }
 0x439   :  { %v603_v12 = vadd.f32 %v944_v11, %v601_v10 }
 0x43c   :  { %v606_v13 = vpop.permute.xlu1 %605 }
 0x43d   :  { %v608_v14 = vadd.f32 %v606_v13, %v603_v12 }
 0x43f   :  { %945 = vrcp.f32 %v608_v14 }
 0x449   :  { %v946_v16 = vpop.eup %945 }
 0x44a   :  { %629 = vrot.lane.b32.xlu1 %v946_v16, %s1235_s27  ;;  %618 = vrot.lane.b32.xlu0 %v946_v16, %s1537_s6  ;;  %v610_v17 = vmul.f32 %v946_v16, %v944_v11  ;;  %s647_s6 = sshll.u32 %s1239_s5, 4  ;;  %s648_s6 = int_to_ptr.vmem [resolvable:$true] %s647_s6 }
 0x44b   :  { %s1173_s29 = scalar_lea.vmem %s648_s6, 128  ;;  %p1178_p12 = scmp.lt.s32.totalorder %s648_s6, %s648_s6 }
 0x44c   :  { %p1174_p11 = scmp.ne.s32.totalorder %s648_s6, %s1173_s29  ;;  %p1179_p13 = scmp.lt.s32.totalorder %s1173_s29, %s1173_s29 }
 0x44e   :  { %613 = vperm.xlu0 %903, %v610_v17   ;;  %p1180_p0 = por %p1179_p13, %p1178_p12 }
 0x450   :  { %p1181_p1 = pnand %p1180_p0, %p1174_p11 }
 0x452   :  { %906 = vset.pattern.permute.xlu0 %v1238_v18 }
 0x4bc   :  { %v619_v19 = vpop.permute.xlu0 %618  ;;  %v630_v22 = vpop.permute.xlu1 %629 }
 0x4bd   :  { %v621_v20 = vmul.f32 %v940_v5, %v619_v19  ;;  %v632_v23 = vmul.f32 %v942_v6, %v630_v22 }
 0x4bf   :  { %624 = vperm.xlu1 %904, %v621_v20  }
 0x4c3   :  { %905 = vset.pattern.permute.xlu1 %v1238_v18 }
 0x4c4   :  { %635 = vperm.xlu1 %905, %v632_v23  }
 0x4cd   :  { %v614_v25 = vpop.permute.xlu0 %613 }
 0x4ce   :  { %v616_v29 = vmul.f32 %v614_v25, %v1458_v27 }
 0x53e   :  { %v625_v24 = vpop.permute.xlu1 %624 }
 0x53f   :  { %v627_v26 = vmul.f32 %v625_v24, %v1453_v21 }
 0x541   :  { %v628_v31 = vadd.f32 %v627_v26, %v616_v29 }
 0x543   :  { %v636_v30 = vpop.permute.xlu1 %635 }
 0x544   :  { %v638_v32 = vmul.f32 %v636_v30, %v1460_v28 }
 0x546   :  { %v639_v33 = vadd.f32 %v638_v32, %v628_v31 }
 0x548   :  { %640 = vst [vmem:[#allocation9] sm:$0xff] %v639_v33 }
 0x549   :  { %1184 = shalt.err (!%p1181_p1)
}
 0x54a   :  { %s1539_s2 = sld [smem:[#allocation29_spill]] }
 0x550   :  { %s1185_s12 = scalar_lea.hbm %s1539_s2, 128 }
 0x551   :  { %p1186_p2 = scmp.ne.s32.totalorder %s1539_s2, %s1185_s12  ;;  %p1189_p3 = scmp.lt.u32.totalorder %s1185_s12, %s1539_s2 }
 0x553   :  { %p1191_p4 = pnand %p1189_p3, %p1186_p2 }
 0x555   :  { %1194 = shalt.err (!%p1191_p4)
}
 0x556   :  { %650 = dma.vmem_to_hbm [thread:$0]  %s648_s6, 128, %s1539_s2, [#allocation8]  }
 0x557   :  { %1215 = dma.done.wait [#allocation8], 128  }
 0x558   :  { %1216 = vsyncadd [#allocation8], 4294967168 }
 0x559   :  { %654 = vsyncpa [#allocation7], 1 }
 0x55a   :  { %655 = vsyncpa [#allocation8], 1 }
 0x55b   :  { %656 = vsyncmov [#allocation3] }
 0x55e   :  { %s657_s7 = vpop.sfrf %656 }
 0x55f   :  { %p792_p5 = scmp.ne.s32.totalorder %s657_s7, 0 }
 0x561   :  { %661 = shalt.err (%p792_p5)  }
 0x562   :  { %663 = vsyncmov [#allocation3 + $0x1] }
 0x565   :  { %s664_s10 = vpop.sfrf %663 }
 0x566   :  { %p793_p6 = scmp.ne.s32.totalorder %s664_s10, 0 }
 0x568   :  { %668 = shalt.err (%p793_p6)  }
 0x569   :  { %670 = vsyncmov [#allocation3 + $0x2] }
 0x56c   :  { %s671_s23 = vpop.sfrf %670 }
 0x56d   :  { %p794_p7 = scmp.ne.s32.totalorder %s671_s23, 0 }
 0x56f   :  { %675 = shalt.err (%p794_p7)  }
 0x570   :  { %677 = vsyncmov [#allocation3 + $0x3] }
 0x573   :  { %s678_s13 = vpop.sfrf %677 }
 0x574   :  { %p795_p8 = scmp.ne.s32.totalorder %s678_s13, 0 }
 0x576   :  { %682 = shalt.err (%p795_p8)  }
 0x577   :  { %684 = vsyncmov [#allocation3 + $0x4] }
 0x57a   :  { %s685_s19 = vpop.sfrf %684 }
 0x57b   :  { %p796_p9 = scmp.ne.s32.totalorder %s685_s19, 0 }
 0x57d   :  { %689 = shalt.err (%p796_p9)  }
 0x57e   :  { %691 = vsyncmov [#allocation3 + $0x5] }
 0x581   :  { %s692_s28 = vpop.sfrf %691 }
 0x582   :  { %p797_p10 = scmp.ne.s32.totalorder %s692_s28, 0 }
 0x584   :  { %696 = shalt.err (%p797_p10)  }
 0x585   :  { %698 = vsyncmov [#allocation3 + $0x6] }
 0x588   :  { %s699_s11 = vpop.sfrf %698 }
 0x589   :  { %p798_p11 = scmp.ne.s32.totalorder %s699_s11, 0 }
 0x58b   :  { %703 = shalt.err (%p798_p11)  }
 0x58c   :  { %705 = vsyncmov [#allocation3 + $0x7] }
 0x58f   :  { %s706_s16 = vpop.sfrf %705 }
 0x590   :  { %p799_p12 = scmp.ne.s32.totalorder %s706_s16, 0 }
 0x592   :  { %710 = shalt.err (%p799_p12)  }

</bundles_post_ra>
